<compile_context>
chip_gen: v5e
topology: v5e:2x2
jax: 0.10.0
libtpu: 0.0.40
codegen_flags: <defaults>
</compile_context>

<pallas_src>
import functools

import jax
import jax.numpy as jnp
from jax.experimental import pallas as pl
from jax.experimental.pallas import tpu as pltpu


# ----------------------------- kernels ------------------------------------ #

def _mean_channel_kernel(x_ref, o_ref, *, inv_c):
    # x_ref: (TILE_N, C, TILE_HW) block; o_ref: (TILE_N, TILE_HW).
    # Fused widen+reduce over the channel (sublane) axis, then scale by 1/C.
    s = jnp.sum(x_ref[...], axis=1, dtype=jnp.float32)
    o_ref[...] = (s * jnp.float32(inv_c)).astype(o_ref.dtype)


def _mean_channel_csplit_kernel(x_ref, o_ref, acc_ref, *, inv_c, c_total, tile_c):
    # Large-C path: grid axis 2 ("arbitrary") walks channel blocks of TILE_C.
    # x_ref: (TILE_N, TILE_C, TILE_HW); o_ref: (TILE_N, TILE_HW);
    # acc_ref: f32 VMEM scratch (TILE_N, TILE_HW).
    k = pl.program_id(2)

    @pl.when(k == 0)
    def _():
        acc_ref[...] = jnp.zeros_like(acc_ref)

    x = x_ref[...]
    if c_total % tile_c != 0:
        # Tail channel block reads past C; padded rows are undefined -> mask.
        ch = k * tile_c + jax.lax.broadcasted_iota(jnp.int32, x.shape, 1)
        x = jnp.where(ch < c_total, x, jnp.zeros_like(x))
    acc_ref[...] += jnp.sum(x, axis=1, dtype=jnp.float32)

    @pl.when(k == pl.num_programs(2) - 1)
    def _():
        o_ref[...] = (acc_ref[...] * jnp.float32(inv_c)).astype(o_ref.dtype)


# --------------------------- tiling planner -------------------------------- #

def _cdiv(a, b):
    return (a + b - 1) // b


def _round_up(x, m):
    return (x + m - 1) // m * m


def _sublane_multiple(itemsize):
    # f32 -> 8 sublanes, bf16 -> 16, int8/fp8 -> 32.
    return max(8, 32 // itemsize)


def _vmem_capacity_bytes():
    try:
        cap = int(pltpu.get_tpu_info().vmem_capacity_bytes)
        if cap > 0:
            return cap
    except Exception:
        pass
    return 64 * 1024 * 1024  # conservative default (v7x-sized VMEM)


def _plan(n, c, hw, itemsize, budget, force_c_split):
    """Pick (split?, TILE_N, TILE_HW[, TILE_C]) from a VMEM budget."""
    sub = _sublane_multiple(itemsize)

    # Batch over N: dense (sub,128) output stores + amortized step overhead.
    # When N < sub, TILE_N == N (full dim) which is always a legal block dim.
    tile_n = n if n < sub else sub

    c_pad = _round_up(c, sub)          # sublane-padded channel count (input)
    out_pad = _round_up(tile_n, sub)   # sublane-padded output rows

    # Simple path: full-C block, tile over HW only. Double-buffered in + out.
    per_lane_simple = 2 * itemsize * (tile_n * c_pad + out_pad)
    max_tile_hw = budget // per_lane_simple

    need_split = force_c_split or max_tile_hw < min(hw, 512)

    if not need_split:
        tile_hw = min(hw, max_tile_hw)
        if tile_hw < hw:
            tile_hw = max(128, (tile_hw // 128) * 128)
        # Keep >= ~4 grid steps (>=2 per TensorCore on v7x megacore) when the
        # problem is large enough that pipelining matters.
        grid_n = _cdiv(n, tile_n)
        while grid_n * _cdiv(hw, tile_hw) < 4 and tile_hw >= 2048:
            tile_hw = max(1024, (tile_hw // 2) // 128 * 128)
        return {"split": False, "tile_n": tile_n, "tile_hw": tile_hw}

    # C-split path: bound the block by splitting channels across grid axis 2.
    tile_hw = min(hw, 1024)
    if tile_hw < hw:
        tile_hw = max(128, (tile_hw // 128) * 128)
    acc_bytes_per_lane = _round_up(tile_n, 8) * 4       # f32 scratch
    out_bytes_per_lane = 2 * out_pad * itemsize         # double-buffered out
    fixed = (acc_bytes_per_lane + out_bytes_per_lane) * tile_hw
    remaining = max(budget - fixed, 2 * itemsize * tile_n * sub * tile_hw)
    tile_c = remaining // (2 * itemsize * tile_n * tile_hw)
    tile_c = max(sub, (tile_c // sub) * sub)
    tile_c = min(tile_c, c_pad)
    if force_c_split:
        tile_c = min(tile_c, sub)   # force multi-step accumulation (tests)
    if tile_c >= c:
        tile_c = c                  # single full-extent channel block
    return {"split": True, "tile_n": tile_n, "tile_hw": tile_hw, "tile_c": tile_c}


# ------------------------------ wrapper ------------------------------------ #

def average_pool_channel(x, *, vmem_budget_bytes=None, vmem_limit_bytes=None,
                         force_c_split=False):
    """Pallas equivalent of torch.mean(input, dim=1, keepdim=True) for NCHW."""
    n, c, h, w = x.shape
    hw = h * w
    itemsize = jnp.dtype(x.dtype).itemsize

    vmem_cap = _vmem_capacity_bytes()
    if vmem_budget_bytes is None:
        # ~24 MiB tiling budget on v7x (64 MiB VMEM), ~48 MiB on v5e/v6e (128 MiB).
        vmem_budget_bytes = vmem_cap * 3 // 8
    if vmem_limit_bytes is None:
        # ~40 MiB scoped limit on v7x, ~80 MiB on v5e/v6e: headroom for scratch.
        vmem_limit_bytes = vmem_cap * 5 // 8

    plan = _plan(n, c, hw, itemsize, int(vmem_budget_bytes), force_c_split)
    tile_n, tile_hw = plan["tile_n"], plan["tile_hw"]

    x_flat = x.reshape(n, c, hw)
    out_shape = jax.ShapeDtypeStruct((n, hw), x.dtype)
    inv_c = 1.0 / float(c)

    if not plan["split"]:
        grid = (_cdiv(n, tile_n), _cdiv(hw, tile_hw))
        out_flat = pl.pallas_call(
            functools.partial(_mean_channel_kernel, inv_c=inv_c),
            out_shape=out_shape,
            grid_spec=pltpu.PrefetchScalarGridSpec(
                num_scalar_prefetch=0,
                grid=grid,
                in_specs=[pl.BlockSpec((tile_n, c, tile_hw),
                                       lambda i, j: (i, 0, j))],
                out_specs=pl.BlockSpec((tile_n, tile_hw), lambda i, j: (i, j)),
            ),
            compiler_params=pltpu.CompilerParams(
                dimension_semantics=("parallel", "parallel"),
                vmem_limit_bytes=int(vmem_limit_bytes),
            ),
        )(x_flat)
    else:
        tile_c = plan["tile_c"]
        grid = (_cdiv(n, tile_n), _cdiv(hw, tile_hw), _cdiv(c, tile_c))
        out_flat = pl.pallas_call(
            functools.partial(_mean_channel_csplit_kernel, inv_c=inv_c,
                              c_total=c, tile_c=tile_c),
            out_shape=out_shape,
            grid_spec=pltpu.PrefetchScalarGridSpec(
                num_scalar_prefetch=0,
                grid=grid,
                in_specs=[pl.BlockSpec((tile_n, tile_c, tile_hw),
                                       lambda i, j, k: (i, k, j))],
                out_specs=pl.BlockSpec((tile_n, tile_hw),
                                       lambda i, j, k: (i, j)),
                scratch_shapes=[pltpu.VMEM((tile_n, tile_hw), jnp.float32)],
            ),
            compiler_params=pltpu.CompilerParams(
                dimension_semantics=("parallel", "parallel", "arbitrary"),
                vmem_limit_bytes=int(vmem_limit_bytes),
            ),
        )(x_flat)

    return out_flat.reshape(n, 1, h, w)


# ------------------------------- tests -------------------------------------- #

if __name__ == "__main__":
    key = jax.random.PRNGKey(0)
    k1, k2, k3 = jax.random.split(key, 3)

    # 1) Module-sized input (N=2, C=4, H=W=16): simple full-C path.
    x1 = jax.random.normal(k1, (2, 4, 16, 16), dtype=jnp.float32)
    o1 = jax.block_until_ready(average_pool_channel(x1))
    r1 = jnp.mean(x1, axis=1, keepdims=True)
    assert o1.shape == (2, 1, 16, 16), f"bad shape {o1.shape}"
    assert jnp.allclose(o1, r1, atol=1e-5, rtol=1e-5), "mismatch (simple path)"

    # 2) N-batched simple path (TILE_N=8 dense output stores).
    x2 = jax.random.normal(k2, (16, 4, 8, 16), dtype=jnp.float32)
    o2 = jax.block_until_ready(average_pool_channel(x2))
    r2 = jnp.mean(x2, axis=1, keepdims=True)
    assert o2.shape == (16, 1, 8, 16), f"bad shape {o2.shape}"
    assert jnp.allclose(o2, r2, atol=1e-5, rtol=1e-5), "mismatch (N-batched path)"

    # 3) Large-C fallback path, forced at small scale: C split over an
    #    "arbitrary" grid axis, f32 accumulator, tail-channel masking (C=12,
    #    TILE_C=8 -> 2 channel steps, 4 padded tail channels).
    x3 = jax.random.normal(k3, (16, 12, 8, 16), dtype=jnp.float32)
    o3 = jax.block_until_ready(average_pool_channel(x3, force_c_split=True))
    r3 = jnp.mean(x3, axis=1, keepdims=True)
    assert o3.shape == (16, 1, 8, 16), f"bad shape {o3.shape}"
    assert jnp.allclose(o3, r3, atol=1e-5, rtol=1e-5), "mismatch (C-split path)"

    print("KERNEL_OK")
</pallas_src>

<mosaic_0001>
module attributes {stable_mosaic.version = 11 : i64} {
  func.func @_mean_channel_kernel(%arg0: i32, %arg1: i32, %arg2: memref<2x4x256xf32, #tpu.memory_space<vmem>>, %arg3: memref<2x256xf32, #tpu.memory_space<vmem>>) attributes {dimension_semantics = [#tpu.dimension_semantics<parallel>, #tpu.dimension_semantics<parallel>], iteration_bounds = array<i64: 1, 1>, scalar_prefetch = 0 : i64, scratch_operands = 0 : i64, tpu.core_type = #tpu.core_type<tc>, window_params = [{transform_indices = @transform_0, window_bounds = array<i64: 2, 4, 256>}, {transform_indices = @transform_1, window_bounds = array<i64: 2, 256>}]} {
    %c0 = arith.constant 0 : index
    %c0_0 = arith.constant 0 : index
    %c0_1 = arith.constant 0 : index
    %0 = vector.load %arg2[%c0, %c0_0, %c0_1] : memref<2x4x256xf32, #tpu.memory_space<vmem>>, vector<2x4x256xf32>
    %cst = arith.constant dense<0.000000e+00> : vector<2x256xf32>
    %1 = vector.multi_reduction <add>, %0, %cst [1] : vector<2x4x256xf32> to vector<2x256xf32>
    %cst_2 = arith.constant 2.500000e-01 : f32
    %2 = vector.broadcast %cst_2 : f32 to vector<2x256xf32>
    %3 = arith.mulf %1, %2 : vector<2x256xf32>
    %c0_3 = arith.constant 0 : index
    %c0_4 = arith.constant 0 : index
    %4 = vector.load %arg3[%c0_3, %c0_4] : memref<2x256xf32, #tpu.memory_space<vmem>>, vector<2x256xf32>
    tpu.vector_store %arg3[%c0_3, %c0_4], %3 {strides = array<i32>} : memref<2x256xf32, #tpu.memory_space<vmem>>, vector<2x256xf32>,
    return
  }
  func.func @transform_0(%arg0: i32, %arg1: i32) -> (i32, i32, i32) {
    %c0_i32 = arith.constant 0 : i32
    %c0_i32_0 = arith.constant 0 : i32
    return %arg0, %c0_i32, %arg1 : i32, i32, i32
  }
  func.func @transform_1(%arg0: i32, %arg1: i32) -> (i32, i32) {
    %c0_i32 = arith.constant 0 : i32
    return %arg0, %arg1 : i32, i32
  }
}

</mosaic_0001>

<bundles_post_ra>
// kernel: tpu_custom_call.1
= control target key start
LH: loop header
LB: loop body
LE: loop exit
PB: predicated region body
PF: predicated region fallthrough
CT: control target
= control target key end

     0   :  { %6 = vsyncpa [#allocation3], 0  ;;  %s190_s0 = inlined_call_operand.hbm [shape: f32[2,4,256], index: 0, kind: input, shape index: {}]   ;;  %s191_s1 = inlined_call_operand.hbm [shape: f32[2,256], index: 1, kind: output, shape index: {}]  }
   0x1   :  { %7 = vsyncpa [#allocation4], 0  ;;  %s12_s8 = sshll.u32 %s190_s0, 4  ;;  %s170_s9 = smov [#allocation2]   ;;  %s13_s8 = int_to_ptr.hbm [resolvable:$true] %s12_s8 }
   0x2   :  { %s14_s10 = sshll.u32 %s170_s9, 4  ;;  %s171_s11 = smov 128   ;;  %s15_s10 = int_to_ptr.vmem [resolvable:$true] %s14_s10 }
   0x3   :  { %s172_s12 = smov 8  }
   0x4   :  { %20 = dma.hbm_to_vmem [thread:$0]  %s13_s8, 256, %s15_s10, [#allocation3], %s171_s11, %s171_s11, %s172_s12  }
   0x5   :  { %166 = dma.done.wait [#allocation3], 256  }
   0x6   :  { %167 = vsyncadd [#allocation3], 4294967040  ;;  %v25_v0 = vld [vmem:[#allocation2] sm:$0xff]  ;;  %v26_v1 = vld [vmem:[#allocation2 + $0x8] sm:$0xff]  ;;  %vm40_vm0 = vcmask 1043456   ;;  %vm79_vm1 = vcmask 1041408  }
   0x7   :  { %29 = vst [vmem:[#allocation1] ss:$2 sm:$0xff] %v25_v0  ;;  %vm87_vm2 = vcmask 1041409   ;;  %vm89_vm3 = vcmask 1043459   ;;  %vm91_vm4 = vcmask 1045509   ;;  %s173_s0 = smov [#allocation5]  }
   0x8   :  { %33 = vst [vmem:[#allocation1 + $0x10] ss:$2 sm:$0xff] %v26_v1  ;;  %s102_s13 = sshll.u32 %s173_s0, 4  ;;  %s104_s16 = sshll.u32 %s191_s1, 4  ;;  %vm93_vm5 = vcmask 1047559   ;;  %s103_s13 = int_to_ptr.vmem [resolvable:$true] %s102_s13  ;;  %s105_s16 = int_to_ptr.hbm [resolvable:$true] %s104_s16 }
   0xe   :  { %v30_v2 = vld.sshfl [vmem:[#allocation1] sm:$0xff pattern:$0x75316420]  ;;  %v31_v3 = vld.sshfl [vmem:[#allocation1 + $0x8] sm:$0xff pattern:$0x75316420] }
   0xf   :  { %v34_v4 = vld.sshfl [vmem:[#allocation1 + $0x10] sm:$0xff pattern:$0x75316420]  ;;  %v35_v5 = vld.sshfl [vmem:[#allocation1 + $0x18] sm:$0xff pattern:$0x75316420] }
  0x10   :  { %v41_v6 = vsel %vm40_vm0, %v30_v2, 0.0  ;;  %v48_v7 = vsel %vm40_vm0, %v31_v3, 0.0  ;;  %v55_v8 = vsel %vm40_vm0, %v34_v4, 0.0  ;;  %v62_v9 = vsel %vm40_vm0, %v35_v5, 0.0 }
  0x11   :  { %v42_v10 = vrot.slane %v41_v6, 4  ;;  %v49_v11 = vrot.slane %v48_v7, 4  ;;  %v56_v12 = vrot.slane %v55_v8, 4  ;;  %v63_v13 = vrot.slane %v62_v9, 4 }
  0x13   :  { %v43_v14 = vadd.f32 %v42_v10, %v41_v6  ;;  %v50_v15 = vadd.f32 %v49_v11, %v48_v7  ;;  %v57_v16 = vadd.f32 %v56_v12, %v55_v8  ;;  %v64_v17 = vadd.f32 %v63_v13, %v62_v9 }
  0x15   :  { %v44_v18 = vrot.slane %v43_v14, 2  ;;  %v51_v19 = vrot.slane %v50_v15, 2  ;;  %v58_v20 = vrot.slane %v57_v16, 2  ;;  %v65_v21 = vrot.slane %v64_v17, 2 }
  0x17   :  { %v45_v22 = vadd.f32 %v44_v18, %v43_v14  ;;  %v52_v23 = vadd.f32 %v51_v19, %v50_v15  ;;  %v59_v24 = vadd.f32 %v58_v20, %v57_v16  ;;  %v66_v25 = vadd.f32 %v65_v21, %v64_v17 }
  0x19   :  { %v46_v26 = vrot.slane %v45_v22, 1  ;;  %v53_v27 = vrot.slane %v52_v23, 1  ;;  %v60_v28 = vrot.slane %v59_v24, 1  ;;  %v67_v29 = vrot.slane %v66_v25, 1 }
  0x1b   :  { %v54_v30 = vadd.f32 %v53_v27, %v52_v23  ;;  %v61_v31 = vadd.f32 %v60_v28, %v59_v24  ;;  %v68_v32 = vadd.f32 %v67_v29, %v66_v25  ;;  %v47_v33 = vadd.f32 %v46_v26, %v45_v22 }
  0x1d   :  { %v70_v34 = vmul.f32 0.25, %v54_v30  ;;  %v72_v35 = vmul.f32 0.25, %v68_v32  ;;  %v71_v36 = vmul.f32 0.25, %v61_v31  ;;  %v69_v39 = vmul.f32 0.25, %v47_v33 }
  0x1f   :  { %v77_v37 = vrot.slane %v70_v34, 6  ;;  %v78_v38 = vrot.slane %v72_v35, 6 }
  0x21   :  { %v81_v40 = vsel %vm79_vm1, %v71_v36, %v78_v38  ;;  %v80_v42 = vsel %vm79_vm1, %v69_v39, %v77_v37 }
  0x22   :  { %v86_v41 = vrot.slane %v81_v40, 7 }
  0x24   :  { %v88_v43 = vsel %vm87_vm2, %v86_v41, %v80_v42 }
  0x25   :  { %v90_v44 = vsel %vm89_vm3, %v86_v41, %v88_v43 }
  0x26   :  { %v92_v45 = vsel %vm91_vm4, %v86_v41, %v90_v44 }
  0x27   :  { %v94_v46 = vsel %vm93_vm5, %v86_v41, %v92_v45 }
  0x28   :  { %96 = vst [vmem:[#allocation5] sm:$0xf] %v94_v46 }
  0x29   :  { %107 = dma.vmem_to_hbm [thread:$0]  %s103_s13, 64, %s105_s16, [#allocation4]  }
  0x2a   :  { %168 = dma.done.wait [#allocation4], 64  }
  0x2b   :  { %169 = vsyncadd [#allocation4], 4294967232 }
  0x2c   :  { %112 = vsyncpa [#allocation3], 1 }
  0x2d   :  { %113 = vsyncpa [#allocation4], 1 }

</bundles_post_ra>
